<compile_context>
chip_gen: v6e
topology: v6e:2x2x1
jax: 0.10.0
libtpu: 0.0.40
codegen_flags: <defaults>
</compile_context>

<pallas_src>
import jax
import jax.numpy as jnp
from jax.experimental import pallas as pl
from jax.experimental.pallas import tpu as pltpu


def _thresholds_kernel(thr_ref, out_ref):
    # Pure scalar pass-through of the three learnable parameters
    # (matches the PyTorch forward, which returns the nn.Parameters
    # unchanged).  Both refs live in SMEM, so these are cheap scalar
    # loads/stores with no vector-lane waste.
    out_ref[0] = thr_ref[0]
    out_ref[1] = thr_ref[1]
    out_ref[2] = thr_ref[2]


def learnable_thresholds_forward(thresholds_packed, var, ent, spar):
    """Pallas equivalent of LearnableThresholds.forward.

    thresholds_packed: (3,) float32 = [variance, entropy, sparsity]
    var, ent, spar:    ignored (kept for signature parity with the module).

    Returns the packed (3,) float32 vector [variance, entropy, sparsity].
    Use `thresholds_as_dict` for the PyTorch-style dict view.
    """
    del var, ent, spar  # forward() does not use them in the reference module

    return pl.pallas_call(
        _thresholds_kernel,
        out_shape=jax.ShapeDtypeStruct((3,), jnp.float32),
        # Whole-array SMEM specs: no blocking, no VMEM DMA, no lane-sparse
        # vector stores — the data is three scalars.
        in_specs=[pl.BlockSpec(memory_space=pltpu.MemorySpace.SMEM)],
        out_specs=pl.BlockSpec(memory_space=pltpu.MemorySpace.SMEM),
    )(thresholds_packed)


def thresholds_as_dict(packed):
    """Non-hot-path convenience: PyTorch-style dict view of the packed vector."""
    return {
        "variance": packed[0],
        "entropy": packed[1],
        "sparsity": packed[2],
    }


if __name__ == "__main__":
    # Deterministic "initial_values" (stands in for the module's __init__ args).
    initial_values = {"variance": 0.5, "entropy": 1.25, "sparsity": 0.1}
    thresholds_packed = jnp.array(
        [initial_values["variance"],
         initial_values["entropy"],
         initial_values["sparsity"]],
        dtype=jnp.float32,
    )

    # Small example metric inputs (ignored by forward, exactly as in PyTorch).
    key = jax.random.PRNGKey(0)
    k1, k2, k3 = jax.random.split(key, 3)
    var = jax.random.uniform(k1, (2,), dtype=jnp.float32)
    ent = jax.random.uniform(k2, (2,), dtype=jnp.float32)
    spar = jax.random.uniform(k3, (2,), dtype=jnp.float32)

    packed_out = learnable_thresholds_forward(thresholds_packed, var, ent, spar)
    packed_out = jax.block_until_ready(packed_out)

    # Sanity check against the reference semantics (bit-exact identity copy).
    result = thresholds_as_dict(packed_out)
    assert float(result["variance"]) == initial_values["variance"]
    assert float(result["entropy"]) == initial_values["entropy"]
    assert abs(float(result["sparsity"]) - initial_values["sparsity"]) < 1e-7

    print("KERNEL_OK")
</pallas_src>

<mosaic_0001>
module attributes {stable_mosaic.version = 11 : i64} {
  func.func @_thresholds_kernel(%arg0: memref<3xf32, #tpu.memory_space<smem>>, %arg1: memref<3xf32, #tpu.memory_space<smem>>) attributes {dimension_semantics = [], scalar_prefetch = 0 : i64, scratch_operands = 0 : i64, tpu.core_type = #tpu.core_type<tc>} {
    %c0 = arith.constant 0 : index
    %0 = memref.load %arg0[%c0] : memref<3xf32, #tpu.memory_space<smem>>
    %c0_0 = arith.constant 0 : index
    %1 = memref.load %arg1[%c0_0] : memref<3xf32, #tpu.memory_space<smem>>
    memref.store %0, %arg1[%c0_0] : memref<3xf32, #tpu.memory_space<smem>>
    %c1 = arith.constant 1 : index
    %2 = memref.load %arg0[%c1] : memref<3xf32, #tpu.memory_space<smem>>
    %c1_1 = arith.constant 1 : index
    %3 = memref.load %arg1[%c1_1] : memref<3xf32, #tpu.memory_space<smem>>
    memref.store %2, %arg1[%c1_1] : memref<3xf32, #tpu.memory_space<smem>>
    %c2 = arith.constant 2 : index
    %4 = memref.load %arg0[%c2] : memref<3xf32, #tpu.memory_space<smem>>
    %c2_2 = arith.constant 2 : index
    %5 = memref.load %arg1[%c2_2] : memref<3xf32, #tpu.memory_space<smem>>
    memref.store %4, %arg1[%c2_2] : memref<3xf32, #tpu.memory_space<smem>>
    return
  }
}

</mosaic_0001>

<bundles_post_ra>
// kernel: tpu_custom_call.1
= control target key start
LH: loop header
LB: loop body
LE: loop exit
PB: predicated region body
PF: predicated region fallthrough
CT: control target
= control target key end

     0   :  { %6 = vsyncpa [#allocation3], 0  ;;  %s85_s0 = inlined_call_operand.hbm [shape: f32[3], index: 0, kind: input, shape index: {}]   ;;  %s86_s1 = inlined_call_operand.hbm [shape: f32[3], index: 1, kind: output, shape index: {}]  }
   0x1   :  { %7 = vsyncpa [#allocation4], 0  ;;  %s67_s6 = smov [#allocation2]  }
   0x2   :  { %15 = dma.hbm_to_smem %s85_s0, 16, %s67_s6, [#allocation3]  }
   0x3   :  { %63 = dma.done.wait [#allocation3], 16  }
   0x4   :  { %64 = vsyncadd [#allocation3], 4294967280 }
   0x5   :  { %19 = sfence }
   0x6   :  { %s20_s9 = sld [smem:[#allocation2]]  ;;  %s68_s12 = smov [#allocation5]  }
   0x7   :  { %s43_s10 = sld [smem:[#allocation2 + $0x1]] }
   0x8   :  { %s44_s11 = sld [smem:[#allocation2 + $0x2]] }
   0xc   :  { %22 = sst [smem:[#allocation5]] %s20_s9 }
   0xd   :  { %25 = sst [smem:[#allocation5 + $0x1]] %s43_s10 }
   0xe   :  { %28 = sst [smem:[#allocation5 + $0x2]] %s44_s11 }
   0xf   :  { %36 = dma.smem_to_hbm %s68_s12, 16, %s86_s1, [#allocation4]  }
  0x10   :  { %65 = dma.done.wait [#allocation4], 16  }
  0x11   :  { %66 = vsyncadd [#allocation4], 4294967280 }
  0x12   :  { %40 = sfence }
  0x13   :  { %41 = vsyncpa [#allocation3], 1 }
  0x14   :  { %42 = vsyncpa [#allocation4], 1 }

</bundles_post_ra>
